<compile_context>
chip_gen: v7x
topology: tpu7x:2x2x1
jax: 0.10.0
libtpu: 0.0.40
codegen_flags: <defaults>
</compile_context>

<pallas_src>
import functools

import numpy as np
import jax
import jax.numpy as jnp
from jax import lax
from jax.experimental import pallas as pl
from jax.experimental.pallas import tpu as pltpu


# ----------------------------- small helpers / constant setup -----------------------------

def _round_up(a, b):
    return (a + b - 1) // b * b


def _hann_periodic(n):
    # matches torch.hann_window(n, periodic=True)
    k = jnp.arange(n, dtype=jnp.float32)
    return 0.5 - 0.5 * jnp.cos(2.0 * jnp.pi * k / n)


def _build_bases(n_fft, window, Fp):
    """Fused, window-folded, lane-padded rDFT bases (bf16 for the MXU).

    fwd: (n_fft, 2*Fp)  columns [0:F) = window*cos, [Fp:Fp+F) = -window*sin   (analysis)
    inv: (2*Fp, n_fft)  rows    [0:F) = wf*cos/N*window, [Fp:Fp+F) = -wf*sin/N*window (synthesis)
    Padded frequency columns/rows are zero, so they contribute nothing.
    """
    F = n_fft // 2 + 1
    n = jnp.arange(n_fft, dtype=jnp.float32)[:, None]
    f = jnp.arange(F, dtype=jnp.float32)[None, :]
    theta = 2.0 * jnp.pi * n * f / n_fft                       # (n_fft, F)
    w = window.astype(jnp.float32)

    cfwd = jnp.cos(theta) * w[:, None]                         # analysis window folded in
    sfwd = -jnp.sin(theta) * w[:, None]
    fwd = jnp.zeros((n_fft, 2 * Fp), jnp.float32)
    fwd = fwd.at[:, :F].set(cfwd).at[:, Fp:Fp + F].set(sfwd)

    fi = jnp.arange(F)
    wf = jnp.where((fi == 0) | (fi == n_fft // 2), 1.0, 2.0)[:, None]  # hermitian weights
    cinv = wf * jnp.cos(theta.T) / n_fft * w[None, :]          # synthesis window folded in
    sinv = -wf * jnp.sin(theta.T) / n_fft * w[None, :]
    inv = jnp.zeros((2 * Fp, n_fft), jnp.float32)
    inv = inv.at[:F, :].set(cinv).at[Fp:Fp + F, :].set(sinv)

    return fwd.astype(jnp.bfloat16), inv.astype(jnp.bfloat16)


def _overlap_add(frames, hop, n_overlap):
    """OLA as n_overlap (=4) static shifted adds instead of n_frames serial updates."""
    B, n_frames, N = frames.shape                     # N == n_overlap * hop
    fb = frames.reshape(B, n_frames, n_overlap, hop)
    n_blocks = n_frames + n_overlap - 1
    out = jnp.zeros((B, n_blocks, hop), frames.dtype)
    for k in range(n_overlap):                        # static, tiny trip count
        out = out.at[:, k:k + n_frames, :].add(fb[:, :, k, :])
    return out.reshape(B, n_blocks * hop)


# --------------------------------------- kernel -------------------------------------------

def _make_kernel(Fp):
    def kernel(frames_ref, fwd_ref, inv_ref, biasw_ref, out_ref):
        # fused forward rDFT (windowed): (TM, n_fft) bf16 @ (n_fft, 2*Fp) bf16 -> f32
        spec = jnp.dot(frames_ref[...], fwd_ref[...],
                       preferred_element_type=jnp.float32)     # (TM, 2*Fp) = [Re | Im]
        re = spec[:, :Fp]                                       # lane-aligned slices (Fp % 128 == 0)
        im = spec[:, Fp:]
        # magnitude denoise:  scale = clamp(1 - bias*strength / |X|, 0)
        inv_mag = lax.rsqrt(re * re + im * im + 1e-30)          # EUP; +tiny keeps mag==0 -> scale 0
        scale = jnp.maximum(1.0 - biasw_ref[...] * inv_mag, 0.0)
        scaled = jnp.concatenate([scale * re, scale * im], axis=1).astype(jnp.bfloat16)
        # fused inverse rDFT (+ synthesis window folded into inv basis)
        out_ref[...] = jnp.dot(scaled, inv_ref[...],
                               preferred_element_type=jnp.float32)   # (TM, n_fft) f32
    return kernel


# ------------------------------------ forward wrapper --------------------------------------

def denoiser_forward(audio, bias_spec, strength, *, n_fft, hop, n_overlap, window,
                     tile_m=256):
    """Equivalent of Denoiser.forward(audio, strength). audio: (B, T) float."""
    audio = audio.astype(jnp.float32)
    B, T = audio.shape
    F = n_fft // 2 + 1
    Fp = _round_up(F, 128)            # lane-dense spectra (pad F=129 -> 256, 513 -> 640, ...)
    pad = n_fft // 2

    # torch.stft(center=True, pad_mode='reflect') framing (glue)
    x = jnp.pad(audio, ((0, 0), (pad, pad)), mode='reflect')
    n_frames = 1 + (x.shape[1] - n_fft) // hop
    idx = jnp.arange(n_frames)[:, None] * hop + jnp.arange(n_fft)[None, :]
    frames = x[:, idx].reshape(B * n_frames, n_fft).astype(jnp.bfloat16)

    M = B * n_frames
    # Big tiles feed the MXU, but cap so the grid keeps >= 2 parallel steps (v7x megacore).
    tm = max(8, min(tile_m, _round_up((M + 1) // 2, 8)))
    Mp = _round_up(M, tm)
    frames = jnp.pad(frames, ((0, Mp - M), (0, 0)))

    fwd_basis, inv_basis = _build_bases(n_fft, window, Fp)
    biasw = jnp.pad((bias_spec.reshape(1, F) * strength).astype(jnp.float32),
                    ((0, 0), (0, Fp - F)))

    # TODO(synk): at production n_fft=1024 on v7x, single-buffer the constant bases
    # (pipeline_mode=pl.Buffered(1)) / raise vmem_limit_bytes to keep headroom for tile_m.
    out_frames = pl.pallas_call(
        _make_kernel(Fp),
        out_shape=jax.ShapeDtypeStruct((Mp, n_fft), jnp.float32),
        grid_spec=pl.GridSpec(
            grid=(Mp // tm,),
            in_specs=[
                pl.BlockSpec((tm, n_fft), lambda i: (i, 0)),        # frames (bf16)
                pl.BlockSpec((n_fft, 2 * Fp), lambda i: (0, 0)),    # fused fwd basis (bf16, const)
                pl.BlockSpec((2 * Fp, n_fft), lambda i: (0, 0)),    # fused inv basis (bf16, const)
                pl.BlockSpec((1, Fp), lambda i: (0, 0)),            # bias*strength (f32, const)
            ],
            out_specs=pl.BlockSpec((tm, n_fft), lambda i: (i, 0)),
        ),
        compiler_params=pltpu.CompilerParams(dimension_semantics=("parallel",)),
    )(frames, fwd_basis, inv_basis, biasw)

    # torch.istft tail: overlap-add, window-square envelope normalization, center trim (glue)
    out_frames = out_frames[:M].reshape(B, n_frames, n_fft)
    y = _overlap_add(out_frames, hop, n_overlap)
    env = _overlap_add(jnp.broadcast_to((window.astype(jnp.float32) ** 2)[None, None, :],
                                        (1, n_frames, n_fft)), hop, n_overlap)[0]
    sl = slice(pad, pad + hop * (n_frames - 1))
    return y[:, sl] / env[sl][None, :]


# ------------------------------------ pure-JAX reference -----------------------------------

def stft_ref(audio, n_fft, hop, window):
    pad = n_fft // 2
    x = jnp.pad(audio.astype(jnp.float32), ((0, 0), (pad, pad)), mode='reflect')
    n_frames = 1 + (x.shape[1] - n_fft) // hop
    idx = jnp.arange(n_frames)[:, None] * hop + jnp.arange(n_fft)[None, :]
    frames = x[:, idx] * window[None, None, :]
    spec = jnp.fft.rfft(frames, axis=-1)        # (B, n_frames, F)
    return jnp.transpose(spec, (0, 2, 1))       # (B, F, n_frames)  -- torch layout


def istft_ref(spec, n_fft, hop, n_overlap, window):
    frames = jnp.fft.irfft(jnp.transpose(spec, (0, 2, 1)), n=n_fft, axis=-1)
    frames = frames * window[None, None, :]
    B, n_frames, N = frames.shape
    y = _overlap_add(frames, hop, n_overlap)
    env = _overlap_add(jnp.broadcast_to((window ** 2)[None, None, :],
                                        (1, n_frames, N)), hop, n_overlap)[0]
    pad = N // 2
    sl = slice(pad, pad + hop * (n_frames - 1))
    return y[:, sl] / env[sl][None, :]


def denoiser_ref(audio, bias_spec, strength, n_fft, hop, n_overlap, window):
    spec = stft_ref(audio, n_fft, hop, window)
    mag, phase = jnp.abs(spec), jnp.angle(spec)
    den = jnp.maximum(mag - bias_spec * strength, 0.0)
    return jnp.real(istft_ref(den * jnp.exp(1j * phase), n_fft, hop, n_overlap, window))


# ------------------------------------------ main --------------------------------------------

if __name__ == "__main__":
    # small shapes consistent with the module (filter_length=256 instead of 1024, n_overlap=4)
    n_fft = 256
    n_overlap = 4
    hop = n_fft // n_overlap          # 64
    B, T = 2, 1024
    F = n_fft // 2 + 1
    window = _hann_periodic(n_fft)

    key = jax.random.PRNGKey(0)
    k_audio, k_bias = jax.random.split(key)
    audio = jax.random.normal(k_audio, (B, T), dtype=jnp.float32)

    # TODO(synk): the real module derives bias_spec from hifigan(zero-mel) in __init__;
    # here the "bias audio" is synthesized deterministically and passed through the same STFT.
    bias_audio = 0.01 * jax.random.normal(k_bias, (1, 512), dtype=jnp.float32)
    bias_spec_full = jnp.abs(stft_ref(bias_audio, n_fft, hop, window))   # (1, F, n_frames_b)
    bias_spec = bias_spec_full[:, :, 0][:, :, None]                      # (1, F, 1) buffer

    strength = 0.1
    fwd_fn = jax.jit(functools.partial(denoiser_forward, n_fft=n_fft, hop=hop,
                                       n_overlap=n_overlap, window=window))
    out = jax.block_until_ready(fwd_fn(audio, bias_spec, strength))

    ref = denoiser_ref(audio, bias_spec, strength, n_fft, hop, n_overlap, window)
    assert out.shape == (B, hop * (T // hop)), out.shape
    out_np, ref_np = np.asarray(out), np.asarray(ref)
    rel_l2 = np.linalg.norm(out_np - ref_np) / np.linalg.norm(ref_np)
    assert rel_l2 < 1e-2, rel_l2                              # bf16 MXU inputs, f32 accumulation
    np.testing.assert_allclose(out_np, ref_np, rtol=3e-2, atol=3e-2)
    print("KERNEL_OK")
</pallas_src>

<mosaic_0001>
module attributes {stable_mosaic.version = 11 : i64} {
  func.func @kernel(%arg0: i32, %arg1: memref<24x256xbf16, #tpu.memory_space<vmem>>, %arg2: memref<256x512xbf16, #tpu.memory_space<vmem>>, %arg3: memref<512x256xbf16, #tpu.memory_space<vmem>>, %arg4: memref<1x256xf32, #tpu.memory_space<vmem>>, %arg5: memref<24x256xf32, #tpu.memory_space<vmem>>) attributes {dimension_semantics = [#tpu.dimension_semantics<parallel>], iteration_bounds = array<i64: 2>, scalar_prefetch = 0 : i64, scratch_operands = 0 : i64, tpu.core_type = #tpu.core_type<tc>, window_params = [{transform_indices = @transform_0, window_bounds = array<i64: 24, 256>}, {pipeline_mode = #tpu.pipeline_mode<synchronous>, transform_indices = @transform_1, window_bounds = array<i64: 256, 512>}, {pipeline_mode = #tpu.pipeline_mode<synchronous>, transform_indices = @transform_2, window_bounds = array<i64: 512, 256>}, {pipeline_mode = #tpu.pipeline_mode<synchronous>, transform_indices = @transform_3, window_bounds = array<i64: 1, 256>}, {transform_indices = @transform_4, window_bounds = array<i64: 24, 256>}]} {
    %c0 = arith.constant 0 : index
    %c0_0 = arith.constant 0 : index
    %0 = vector.load %arg1[%c0, %c0_0] : memref<24x256xbf16, #tpu.memory_space<vmem>>, vector<24x256xbf16>
    %c0_1 = arith.constant 0 : index
    %c0_2 = arith.constant 0 : index
    %1 = vector.load %arg2[%c0_1, %c0_2] : memref<256x512xbf16, #tpu.memory_space<vmem>>, vector<256x512xbf16>
    %cst = arith.constant dense<0.000000e+00> : vector<24x512xf32>
    %2 = tpu.matmul %0, %1, %cst {dimension_numbers = #tpu.dot_dimension_numbers<[1], [0], [0], [1], [0, 0, 1, 1], [], []>} : vector<24x256xbf16>, vector<256x512xbf16>, vector<24x512xf32> -> vector<24x512xf32>
    %3 = vector.extract_strided_slice %2 {offsets = [0, 0], sizes = [24, 256], strides = [1, 1]} : vector<24x512xf32> to vector<24x256xf32>
    %4 = vector.extract_strided_slice %2 {offsets = [0, 256], sizes = [24, 256], strides = [1, 1]} : vector<24x512xf32> to vector<24x256xf32>
    %5 = arith.mulf %3, %3 : vector<24x256xf32>
    %6 = arith.mulf %4, %4 : vector<24x256xf32>
    %7 = arith.addf %5, %6 : vector<24x256xf32>
    %cst_3 = arith.constant 1.000000e-30 : f32
    %8 = vector.broadcast %cst_3 : f32 to vector<24x256xf32>
    %9 = arith.addf %7, %8 : vector<24x256xf32>
    %10 = math.rsqrt %9 : vector<24x256xf32>
    %c0_4 = arith.constant 0 : index
    %c0_5 = arith.constant 0 : index
    %11 = vector.load %arg4[%c0_4, %c0_5] : memref<1x256xf32, #tpu.memory_space<vmem>>, vector<1x256xf32>
    %12 = vector.broadcast %11 : vector<1x256xf32> to vector<24x256xf32>
    %13 = arith.mulf %12, %10 : vector<24x256xf32>
    %cst_6 = arith.constant 1.000000e+00 : f32
    %14 = vector.broadcast %cst_6 : f32 to vector<24x256xf32>
    %15 = arith.subf %14, %13 : vector<24x256xf32>
    %cst_7 = arith.constant 0.000000e+00 : f32
    %16 = vector.broadcast %cst_7 : f32 to vector<24x256xf32>
    %17 = arith.maximumf %15, %16 : vector<24x256xf32>
    %18 = arith.mulf %17, %3 : vector<24x256xf32>
    %19 = arith.mulf %17, %4 : vector<24x256xf32>
    %20 = tpu.concatenate %18, %19 in 1 : vector<24x256xf32>, vector<24x256xf32> -> vector<24x512xf32>
    %21 = arith.truncf %20 : vector<24x512xf32> to vector<24x512xbf16>
    %c0_8 = arith.constant 0 : index
    %c0_9 = arith.constant 0 : index
    %22 = vector.load %arg3[%c0_8, %c0_9] : memref<512x256xbf16, #tpu.memory_space<vmem>>, vector<512x256xbf16>
    %cst_10 = arith.constant dense<0.000000e+00> : vector<24x256xf32>
    %23 = tpu.matmul %21, %22, %cst_10 {dimension_numbers = #tpu.dot_dimension_numbers<[1], [0], [0], [1], [0, 0, 1, 1], [], []>} : vector<24x512xbf16>, vector<512x256xbf16>, vector<24x256xf32> -> vector<24x256xf32>
    %c0_11 = arith.constant 0 : index
    %c0_12 = arith.constant 0 : index
    %24 = vector.load %arg5[%c0_11, %c0_12] : memref<24x256xf32, #tpu.memory_space<vmem>>, vector<24x256xf32>
    tpu.vector_store %arg5[%c0_11, %c0_12], %23 {strides = array<i32>} : memref<24x256xf32, #tpu.memory_space<vmem>>, vector<24x256xf32>,
    return
  }
  func.func @transform_0(%arg0: i32) -> (i32, i32) {
    %c0_i32 = arith.constant 0 : i32
    %c0_i32_0 = arith.constant 0 : i32
    return %arg0, %c0_i32 : i32, i32
  }
  func.func @transform_1(%arg0: i32) -> (i32, i32) {
    %c0_i32 = arith.constant 0 : i32
    %c0_i32_0 = arith.constant 0 : i32
    %c0_i32_1 = arith.constant 0 : i32
    return %c0_i32, %c0_i32_0 : i32, i32
  }
  func.func @transform_2(%arg0: i32) -> (i32, i32) {
    %c0_i32 = arith.constant 0 : i32
    %c0_i32_0 = arith.constant 0 : i32
    %c0_i32_1 = arith.constant 0 : i32
    return %c0_i32, %c0_i32_0 : i32, i32
  }
  func.func @transform_3(%arg0: i32) -> (i32, i32) {
    %c0_i32 = arith.constant 0 : i32
    %c0_i32_0 = arith.constant 0 : i32
    %c0_i32_1 = arith.constant 0 : i32
    return %c0_i32, %c0_i32_0 : i32, i32
  }
  func.func @transform_4(%arg0: i32) -> (i32, i32) {
    %c0_i32 = arith.constant 0 : i32
    %c0_i32_0 = arith.constant 0 : i32
    return %arg0, %c0_i32 : i32, i32
  }
}

</mosaic_0001>

<bundles_post_ra>
// kernel: denoiser_forward.1
= control target key start
LH: loop header
LB: loop body
LE: loop exit
PB: predicated region body
PF: predicated region fallthrough
CT: control target
= control target key end

     0   :  { %s1745_s15 = smov 0   ;;  %s2213_s0 = inlined_call_operand.vmem [shape: bf16[48,256], index: 0, kind: input, shape index: {}]   ;;  %s2214_s1 = inlined_call_operand.vmem [shape: bf16[256,512], index: 1, kind: input, shape index: {}]   ;;  %s2215_s2 = inlined_call_operand.vmem [shape: bf16[512,256], index: 2, kind: input, shape index: {}]   ;;  %s2216_s3 = inlined_call_operand.vmem [shape: f32[1,256], index: 3, kind: input, shape index: {}]   ;;  %s2217_s4 = inlined_call_operand.vmem [shape: f32[48,256], index: 4, kind: output, shape index: {}]  }
   0x1 LB: > { %s1342_s16 = sadd.s32 4294967295, %s1718_s15   ;;  %p1346_p0 = scmp.ge.s32.totalorder %s1718_s15, 1  ;;  %s1718_s15 = sphi %s1745_s15, %s14_s15  }
   0x2   : > { %p164_p1 = scmp.lt.s32.totalorder %s1718_s15, 3 }
   0x4   : > { %p165_p2 = pnand %p1346_p0, %p164_p1 }
   0x5   : > { %v1503_v0 = vld [vmem:[%s2214_s1 + $0x4] ss:$16 sps:$4 sm:$0xff] (!%p165_p2)   ;;  %v1505_v1 = vld [vmem:[%s2214_s1] ss:$16 sps:$4 sm:$0xff] (!%p165_p2)   ;;  %s192_s27 = smul.u32 (!%p165_p2), 3, %s1342_s16 }
   0x6   : > { %168 = sbr.rel (%p165_p2) target bundleno = 664 (0x298), region = 36  ;;  %610 = vmatprep.subr.bf16.mxu1 (!%p165_p2), %v1503_v0  ;;  %v1506_v2 = vld [vmem:[%s2214_s1 + $0x24] ss:$16 sps:$4 sm:$0xff] (!%p165_p2)   ;;  %v1508_v3 = vld [vmem:[%s2214_s1 + $0x20] ss:$16 sps:$4 sm:$0xff] (!%p165_p2)  }
   0x7   : > { %611 = vmatpush1.bf16.msra.mxu1 (!%p165_p2), %v1505_v1  ;;  %v1509_v4 = vld [vmem:[%s2214_s1 + $0x44] ss:$16 sps:$4 sm:$0xff] (!%p165_p2)   ;;  %v1511_v5 = vld [vmem:[%s2214_s1 + $0x40] ss:$16 sps:$4 sm:$0xff] (!%p165_p2)   ;;  %p193_p3 = scmp.lt.s32.totalorder (!%p165_p2), %s192_s27, 5 }
   0x8   : > { %612 = vmatprep.subr.bf16.mxu1 (!%p165_p2), %v1506_v2  ;;  %v1512_v6 = vld [vmem:[%s2214_s1 + $0x64] ss:$16 sps:$4 sm:$0xff] (!%p165_p2)   ;;  %v1514_v7 = vld [vmem:[%s2214_s1 + $0x60] ss:$16 sps:$4 sm:$0xff] (!%p165_p2)   ;;  %v1556_v33 = vld [vmem:[%s2214_s1 + $0xc] ss:$16 sps:$4 sm:$0xff] (!%p165_p2)  }
   0x9   : > { %v1515_v8 = vld [vmem:[%s2214_s1 + $0x84] ss:$16 sps:$4 sm:$0xff] (!%p165_p2)   ;;  %v1517_v9 = vld [vmem:[%s2214_s1 + $0x80] ss:$16 sps:$4 sm:$0xff] (!%p165_p2)   ;;  %v1554_v36 = vld [vmem:[%s2214_s1 + $0x8] ss:$16 sps:$4 sm:$0xff] (!%p165_p2)  }
   0xa   : > { %v1518_v10 = vld [vmem:[%s2214_s1 + $0xa4] ss:$16 sps:$4 sm:$0xff] (!%p165_p2)   ;;  %v1520_v11 = vld [vmem:[%s2214_s1 + $0xa0] ss:$16 sps:$4 sm:$0xff] (!%p165_p2)   ;;  %v1559_v37 = vld [vmem:[%s2214_s1 + $0x2c] ss:$16 sps:$4 sm:$0xff] (!%p165_p2)  }
   0xb   : > { %613 = vmatpush1.bf16.msra.mxu1 (!%p165_p2), %v1508_v3  ;;  %v1521_v12 = vld [vmem:[%s2214_s1 + $0xc4] ss:$16 sps:$4 sm:$0xff] (!%p165_p2)   ;;  %v1523_v14 = vld [vmem:[%s2214_s1 + $0xc0] ss:$16 sps:$4 sm:$0xff] (!%p165_p2)   ;;  %v1557_v39 = vld [vmem:[%s2214_s1 + $0x28] ss:$16 sps:$4 sm:$0xff] (!%p165_p2)  }
   0xc   : > { %614 = vmatprep.subr.bf16.mxu1 (!%p165_p2), %v1509_v4  ;;  %v1524_v15 = vld [vmem:[%s2214_s1 + $0xe4] ss:$16 sps:$4 sm:$0xff] (!%p165_p2)   ;;  %v1526_v16 = vld [vmem:[%s2214_s1 + $0xe0] ss:$16 sps:$4 sm:$0xff] (!%p165_p2)   ;;  %v1562_v40 = vld [vmem:[%s2214_s1 + $0x4c] ss:$16 sps:$4 sm:$0xff] (!%p165_p2)  }
   0xd   : > { %s2219_s27 = smov (!%p193_p3, %s192_s27), 5  ;;  %v1527_v17 = vld [vmem:[%s2214_s1 + $0x104] ss:$16 sps:$4 sm:$0xff]   ;;  %v1529_v18 = vld [vmem:[%s2214_s1 + $0x100] ss:$16 sps:$4 sm:$0xff]  }
   0xe   : > { %s1485_s14 = sshll.u32 %s2219_s27, 3  ;;  %v1530_v19 = vld [vmem:[%s2214_s1 + $0x124] ss:$16 sps:$4 sm:$0xff]   ;;  %v1532_v20 = vld [vmem:[%s2214_s1 + $0x120] ss:$16 sps:$4 sm:$0xff]   ;;  %s1486_s16 = sshll.u32 %s2219_s27, 4 }
   0xf   : > { %615 = vmatpush1.bf16.msra.mxu1 %v1511_v5  ;;  %s1795_s20 = scalar_lea.vmem %s2213_s0, %s1485_s14  ;;  %v1533_v21 = vld [vmem:[%s2214_s1 + $0x144] ss:$16 sps:$4 sm:$0xff]   ;;  %v1535_v22 = vld [vmem:[%s2214_s1 + $0x140] ss:$16 sps:$4 sm:$0xff]   ;;  %v1560_v42 = vld [vmem:[%s2214_s1 + $0x48] ss:$16 sps:$4 sm:$0xff]   ;;  %s204_s19 = scalar_lea.vmem %s2217_s4, %s1486_s16 }
  0x10   : > { %616 = vmatprep.subr.bf16.mxu1 %v1512_v6  ;;  %v1553_v13 = vld [vmem:[%s1795_s20 + $0x4] ss:$8 sps:$4 sm:$0xff]   ;;  %v1538_v24 = vld [vmem:[%s2214_s1 + $0x160] ss:$16 sps:$4 sm:$0xff]   ;;  %v1563_v44 = vld [vmem:[%s2214_s1 + $0x68] ss:$16 sps:$4 sm:$0xff]  }
  0x11   : > { %642 = vmatprep.mubr.bf16.mxu1 %v1553_v13  ;;  %v1536_v23 = vld [vmem:[%s2214_s1 + $0x164] ss:$16 sps:$4 sm:$0xff]   ;;  %v1541_v26 = vld [vmem:[%s2214_s1 + $0x180] ss:$16 sps:$4 sm:$0xff]   ;;  %v1565_v43 = vld [vmem:[%s2214_s1 + $0x6c] ss:$16 sps:$4 sm:$0xff]  }
  0x12   : > { %v1539_v25 = vld [vmem:[%s2214_s1 + $0x184] ss:$16 sps:$4 sm:$0xff]   ;;  %v1544_v28 = vld [vmem:[%s2214_s1 + $0x1a0] ss:$16 sps:$4 sm:$0xff]   ;;  %v1568_v45 = vld [vmem:[%s2214_s1 + $0x8c] ss:$16 sps:$4 sm:$0xff]  }
  0x13   : > { %617 = vmatpush1.bf16.msra.mxu1 %v1514_v7  ;;  %v1542_v27 = vld [vmem:[%s2214_s1 + $0x1a4] ss:$16 sps:$4 sm:$0xff]   ;;  %v1547_v30 = vld [vmem:[%s2214_s1 + $0x1c0] ss:$16 sps:$4 sm:$0xff]   ;;  %v1566_v46 = vld [vmem:[%s2214_s1 + $0x88] ss:$16 sps:$4 sm:$0xff]  }
  0x14   : > { %618 = vmatprep.subr.bf16.mxu1 %v1515_v8  ;;  %v1545_v29 = vld [vmem:[%s2214_s1 + $0x1c4] ss:$16 sps:$4 sm:$0xff]   ;;  %v1550_v32 = vld [vmem:[%s2214_s1 + $0x1e0] ss:$16 sps:$4 sm:$0xff]   ;;  %v1571_v47 = vld [vmem:[%s2214_s1 + $0xac] ss:$16 sps:$4 sm:$0xff]  }
  0x15   : > { %v1548_v31 = vld [vmem:[%s2214_s1 + $0x1e4] ss:$16 sps:$4 sm:$0xff]   ;;  %v1863_v35 = vld [vmem:[%s1795_s20] ss:$8 sps:$4 sm:$0xff]   ;;  %v1574_v49 = vld [vmem:[%s2214_s1 + $0xcc] ss:$16 sps:$4 sm:$0xff]  }
  0x16   : > { %v208_v34 = vld [vmem:[%s1795_s20 + $0x10] sm:$0xff]  ;;  %v1569_v48 = vld [vmem:[%s2214_s1 + $0xa8] ss:$16 sps:$4 sm:$0xff]   ;;  %v1577_v51 = vld [vmem:[%s2214_s1 + $0xec] ss:$16 sps:$4 sm:$0xff]  }
  0x17   : > { %619 = vmatpush1.bf16.msra.mxu1 %v1517_v9  ;;  %v1871_v38 = vcombine.high %v208_v34, %v208_v34  ;;  %v1353_v41 = vcombine.low %v208_v34, %v208_v34  ;;  %v1572_v50 = vld [vmem:[%s2214_s1 + $0xc8] ss:$16 sps:$4 sm:$0xff]   ;;  %v1580_v53 = vld [vmem:[%s2214_s1 + $0x10c] ss:$16 sps:$4 sm:$0xff]  }
  0x18   : > { %620 = vmatprep.subr.bf16.mxu1 %v1518_v10  ;;  %v1575_v52 = vld [vmem:[%s2214_s1 + $0xe8] ss:$16 sps:$4 sm:$0xff]   ;;  %v1583_v55 = vld [vmem:[%s2214_s1 + $0x12c] ss:$16 sps:$4 sm:$0xff]  }
  0x19   : > { %v1578_v54 = vld [vmem:[%s2214_s1 + $0x108] ss:$16 sps:$4 sm:$0xff]   ;;  %v1586_v57 = vld [vmem:[%s2214_s1 + $0x14c] ss:$16 sps:$4 sm:$0xff]  }
  0x1a   : > { %v1581_v56 = vld [vmem:[%s2214_s1 + $0x128] ss:$16 sps:$4 sm:$0xff]   ;;  %v1589_v59 = vld [vmem:[%s2214_s1 + $0x16c] ss:$16 sps:$4 sm:$0xff]  }
  0x1b   : > { %621 = vmatpush1.bf16.msra.mxu1 %v1520_v11  ;;  %v1584_v58 = vld [vmem:[%s2214_s1 + $0x148] ss:$16 sps:$4 sm:$0xff]   ;;  %v1592_v61 = vld [vmem:[%s2214_s1 + $0x18c] ss:$16 sps:$4 sm:$0xff]  }
  0x1c   : > { %622 = vmatprep.subr.bf16.mxu1 %v1521_v12  ;;  %v1587_v60 = vld [vmem:[%s2214_s1 + $0x168] ss:$16 sps:$4 sm:$0xff]   ;;  %v1596_v63 = vld [vmem:[%s2214_s1 + $0x1ac] ss:$16 sps:$4 sm:$0xff]  }
  0x1d   : > { %v1590_v62 = vld [vmem:[%s2214_s1 + $0x188] ss:$16 sps:$4 sm:$0xff]   ;;  %v1600_v1 = vld [vmem:[%s2214_s1 + $0x1cc] ss:$16 sps:$4 sm:$0xff]  }
  0x1e   : > { %v1594_v0 = vld [vmem:[%s2214_s1 + $0x1a8] ss:$16 sps:$4 sm:$0xff]   ;;  %v1603_v3 = vld [vmem:[%s2214_s1 + $0x1ec] ss:$16 sps:$4 sm:$0xff]  }
  0x1f   : > { %623 = vmatpush1.bf16.msra.mxu1 %v1523_v14  ;;  %v1598_v2 = vld [vmem:[%s2214_s1 + $0x1c8] ss:$16 sps:$4 sm:$0xff]   ;;  %v1604_v5 = vld [vmem:[%s2215_s2 + $0x4] ss:$8 sps:$4 sm:$0xff]   ;;  %v1607_v7 = vld [vmem:[%s2215_s2 + $0x14] ss:$8 sps:$4 sm:$0xff]  }
  0x20   : > { %624 = vmatprep.subr.bf16.mxu1 %v1524_v15  ;;  %v1601_v4 = vld [vmem:[%s2214_s1 + $0x1e8] ss:$16 sps:$4 sm:$0xff]   ;;  %1176 = vmatprep.subr.bf16.mxu0 %v1604_v5  ;;  %v1610_v9 = vld [vmem:[%s2215_s2 + $0x24] ss:$8 sps:$4 sm:$0xff]   ;;  %v1613_v11 = vld [vmem:[%s2215_s2 + $0x34] ss:$8 sps:$4 sm:$0xff]  }
  0x21   : > { %v1606_v6 = vld [vmem:[%s2215_s2] ss:$8 sps:$4 sm:$0xff]   ;;  %v1609_v8 = vld [vmem:[%s2215_s2 + $0x10] ss:$8 sps:$4 sm:$0xff]   ;;  %v1619_v15 = vld [vmem:[%s2215_s2 + $0x54] ss:$8 sps:$4 sm:$0xff]  }
  0x22   : > { %1177 = vmatpush1.bf16.msra.mxu0 %v1606_v6  ;;  %v1612_v10 = vld [vmem:[%s2215_s2 + $0x20] ss:$8 sps:$4 sm:$0xff]   ;;  %v1615_v12 = vld [vmem:[%s2215_s2 + $0x30] ss:$8 sps:$4 sm:$0xff]  }
  0x23   : > { %625 = vmatpush1.bf16.msra.mxu1 %v1526_v16  ;;  %1178 = vmatprep.subr.bf16.mxu0 %v1607_v7  ;;  %v1618_v14 = vld [vmem:[%s2215_s2 + $0x40] ss:$8 sps:$4 sm:$0xff]   ;;  %v1621_v16 = vld [vmem:[%s2215_s2 + $0x50] ss:$8 sps:$4 sm:$0xff]  }
  0x24   : > { %626 = vmatprep.subr.bf16.mxu1 %v1527_v17  ;;  %v1622_v17 = vld [vmem:[%s2215_s2 + $0x64] ss:$8 sps:$4 sm:$0xff]   ;;  %v1648_v34 = vld [vmem:[%s2215_s2 + $0xe0] ss:$8 sps:$4 sm:$0xff]  }
  0x26   : > { %1179 = vmatpush1.bf16.msra.mxu0 %v1609_v8 }
  0x27   : > { %627 = vmatpush1.bf16.msra.mxu1 %v1529_v18  ;;  %1180 = vmatprep.subr.bf16.mxu0 %v1610_v9  ;;  %v1624_v18 = vld [vmem:[%s2215_s2 + $0x60] ss:$8 sps:$4 sm:$0xff]  }
  0x28   : > { %628 = vmatprep.subr.bf16.mxu1 %v1530_v19  ;;  %v1625_v19 = vld [vmem:[%s2215_s2 + $0x74] ss:$8 sps:$4 sm:$0xff]  }
  0x2a   : > { %1181 = vmatpush1.bf16.msra.mxu0 %v1612_v10 }
  0x2b   : > { %629 = vmatpush1.bf16.msra.mxu1 %v1532_v20  ;;  %1182 = vmatprep.subr.bf16.mxu0 %v1613_v11  ;;  %v1627_v20 = vld [vmem:[%s2215_s2 + $0x70] ss:$8 sps:$4 sm:$0xff]  }
  0x2c   : > { %630 = vmatprep.subr.bf16.mxu1 %v1533_v21  ;;  %v1628_v21 = vld [vmem:[%s2215_s2 + $0x84] ss:$8 sps:$4 sm:$0xff]  }
  0x2e   : > { %1183 = vmatpush1.bf16.msra.mxu0 %v1615_v12  ;;  %v742_v12 = vld [vmem:[%s2216_s3] sm:$0x3] }
  0x2f   : > { %631 = vmatpush1.bf16.msra.mxu1 %v1535_v22  ;;  %v1630_v22 = vld [vmem:[%s2215_s2 + $0x80] ss:$8 sps:$4 sm:$0xff]  }
  0x30   : > { %632 = vmatprep.subr.bf16.mxu1 %v1536_v23  ;;  %v1631_v23 = vld [vmem:[%s2215_s2 + $0x94] ss:$8 sps:$4 sm:$0xff]  }
  0x33   : > { %633 = vmatpush1.bf16.msra.mxu1 %v1538_v24  ;;  %v1633_v24 = vld [vmem:[%s2215_s2 + $0x90] ss:$8 sps:$4 sm:$0xff]  }
  0x34   : > { %634 = vmatprep.subr.bf16.mxu1 %v1539_v25  ;;  %v1634_v25 = vld [vmem:[%s2215_s2 + $0xa4] ss:$8 sps:$4 sm:$0xff]  }
  0x37   : > { %635 = vmatpush1.bf16.msra.mxu1 %v1541_v26  ;;  %v1636_v26 = vld [vmem:[%s2215_s2 + $0xa0] ss:$8 sps:$4 sm:$0xff]  }
  0x38   : > { %636 = vmatprep.subr.bf16.mxu1 %v1542_v27  ;;  %v1637_v27 = vld [vmem:[%s2215_s2 + $0xb4] ss:$8 sps:$4 sm:$0xff]  }
  0x3b   : > { %637 = vmatpush1.bf16.msra.mxu1 %v1544_v28  ;;  %v1639_v28 = vld [vmem:[%s2215_s2 + $0xb0] ss:$8 sps:$4 sm:$0xff]  }
  0x3c   : > { %638 = vmatprep.subr.bf16.mxu1 %v1545_v29  ;;  %v1640_v29 = vld [vmem:[%s2215_s2 + $0xc4] ss:$8 sps:$4 sm:$0xff]  }
  0x3f   : > { %639 = vmatpush1.bf16.msra.mxu1 %v1547_v30  ;;  %v1642_v30 = vld [vmem:[%s2215_s2 + $0xc0] ss:$8 sps:$4 sm:$0xff]  }
  0x40   : > { %640 = vmatprep.subr.bf16.mxu1 %v1548_v31  ;;  %v1643_v31 = vld [vmem:[%s2215_s2 + $0xd4] ss:$8 sps:$4 sm:$0xff]  }
  0x43   : > { %641 = vmatpush1.bf16.msra.mxu1 %v1550_v32  ;;  %v1645_v32 = vld [vmem:[%s2215_s2 + $0xd0] ss:$8 sps:$4 sm:$0xff]  }
  0x44   : > { %661 = vmatprep.subr.bf16.mxu1 %v1556_v33  ;;  %v1646_v33 = vld [vmem:[%s2215_s2 + $0xe4] ss:$8 sps:$4 sm:$0xff]  }
  0x46   : > { %643 = vmatmul.mubr.bf16.vlgmr.msra.gmra.mrb[0].mxu1 %v1863_v35 }
  0x47   : > { %662 = vmatpush1.bf16.msra.mxu1 %v1554_v36  ;;  %652 = vmatprep.mubr.bf16.mxu1 %v1871_v38  ;;  %v1651_v36 = vld [vmem:[%s2215_s2 + $0xf0] ss:$8 sps:$4 sm:$0xff]  }
  0x48   : > { %663 = vmatprep.subr.bf16.mxu1 %v1559_v37  ;;  %v1654_v37 = vld [vmem:[%s2215_s2 + $0x104] ss:$8 sps:$4 sm:$0xff]  }
  0x4b   : > { %664 = vmatpush1.bf16.msra.mxu1 %v1557_v39 }
  0x4c   : > { %665 = vmatprep.subr.bf16.mxu1 %v1562_v40 }
  0x4e   : > { %653 = vmatmul.mubr.bf16.gmra.mrb[4].mxu1 %v1353_v41 }
  0x4f   : > { %666 = vmatpush1.bf16.msra.mxu1 %v1560_v42  ;;  %693 = vmatprep.mubr.bf16.mxu1 %v1553_v13  ;;  %v1616_v13 = vld [vmem:[%s2215_s2 + $0x44] ss:$8 sps:$4 sm:$0xff]  }
  0x50   : > { %667 = vmatprep.subr.bf16.mxu1 %v1565_v43  ;;  %1184 = vmatprep.subr.bf16.mxu0 %v1616_v13 }
  0x51   : > { %1185 = vmatpush1.bf16.msra.mxu0 %v1618_v14 }
  0x52   : > { %1186 = vmatprep.subr.bf16.mxu0 %v1619_v15 }
  0x53   : > { %668 = vmatpush1.bf16.msra.mxu1 %v1563_v44 }
  0x54   : > { %669 = vmatprep.subr.bf16.mxu1 %v1568_v45 }
  0x55   : > { %1187 = vmatpush1.bf16.msra.mxu0 %v1621_v16 }
  0x56   : > { %1188 = vmatprep.subr.bf16.mxu0 %v1622_v17 }
  0x57   : > { %670 = vmatpush1.bf16.msra.mxu1 %v1566_v46 }
  0x58   : > { %671 = vmatprep.subr.bf16.mxu1 %v1571_v47 }
  0x59   : > { %1189 = vmatpush1.bf16.msra.mxu0 %v1624_v18 }
  0x5a   : > { %1190 = vmatprep.subr.bf16.mxu0 %v1625_v19 }
  0x5b   : > { %672 = vmatpush1.bf16.msra.mxu1 %v1569_v48 }
  0x5c   : > { %673 = vmatprep.subr.bf16.mxu1 %v1574_v49 }
  0x5d   : > { %1191 = vmatpush1.bf16.msra.mxu0 %v1627_v20 }
  0x5e   : > { %1192 = vmatprep.subr.bf16.mxu0 %v1628_v21 }
  0x5f   : > { %674 = vmatpush1.bf16.msra.mxu1 %v1572_v50 }
  0x60   : > { %675 = vmatprep.subr.bf16.mxu1 %v1577_v51  ;;  %v744_v51 = vlaneseq }
  0x61   : > { %1193 = vmatpush1.bf16.msra.mxu0 %v1630_v22 }
  0x62   : > { %1194 = vmatprep.subr.bf16.mxu0 %v1631_v23 }
  0x63   : > { %676 = vmatpush1.bf16.msra.mxu1 %v1575_v52 }
  0x64   : > { %677 = vmatprep.subr.bf16.mxu1 %v1580_v53 }
  0x65   : > { %1195 = vmatpush1.bf16.msra.mxu0 %v1633_v24 }
  0x66   : > { %1196 = vmatprep.subr.bf16.mxu0 %v1634_v25 }
  0x67   : > { %678 = vmatpush1.bf16.msra.mxu1 %v1578_v54 }
  0x68   : > { %679 = vmatprep.subr.bf16.mxu1 %v1583_v55 }
  0x69   : > { %1197 = vmatpush1.bf16.msra.mxu0 %v1636_v26 }
  0x6a   : > { %1198 = vmatprep.subr.bf16.mxu0 %v1637_v27 }
  0x6b   : > { %680 = vmatpush1.bf16.msra.mxu1 %v1581_v56 }
  0x6c   : > { %681 = vmatprep.subr.bf16.mxu1 %v1586_v57 }
  0x6d   : > { %1199 = vmatpush1.bf16.msra.mxu0 %v1639_v28 }
  0x6e   : > { %1200 = vmatprep.subr.bf16.mxu0 %v1640_v29 }
  0x6f   : > { %682 = vmatpush1.bf16.msra.mxu1 %v1584_v58 }
  0x70   : > { %683 = vmatprep.subr.bf16.mxu1 %v1589_v59 }
  0x71   : > { %1201 = vmatpush1.bf16.msra.mxu0 %v1642_v30 }
  0x72   : > { %1202 = vmatprep.subr.bf16.mxu0 %v1643_v31 }
  0x73   : > { %684 = vmatpush1.bf16.msra.mxu1 %v1587_v60 }
  0x74   : > { %685 = vmatprep.subr.bf16.mxu1 %v1592_v61 }
  0x75   : > { %1203 = vmatpush1.bf16.msra.mxu0 %v1645_v32 }
  0x76   : > { %1204 = vmatprep.subr.bf16.mxu0 %v1646_v33 }
  0x77   : > { %686 = vmatpush1.bf16.msra.mxu1 %v1590_v62 }
  0x78   : > { %687 = vmatprep.subr.bf16.mxu1 %v1596_v63  ;;  %v745_v63 = vshrl.u32 %v744_v51, 7 }
  0x79   : > { %1205 = vmatpush1.bf16.msra.mxu0 %v1648_v34 }
  0x7a   : > { %v746_v9 = vsub.s32 0, %v745_v63  ;;  %v750_v13 = vsub.s32 1, %v745_v63 }
  0x7b   : > { %688 = vmatpush1.bf16.msra.mxu1 %v1594_v0 }
  0x7c   : > { %689 = vmatprep.subr.bf16.mxu1 %v1600_v1  ;;  %v747_v18 = vrot.slane %v742_v12, %v746_v9  ;;  %v751_v20 = vrot.slane %v742_v12, %v750_v13  ;;  %v1667_v9 = vld [vmem:[%s2215_s2 + $0x150] ss:$8 sps:$4 sm:$0xff]   ;;  %v1675_v12 = vld [vmem:[%s2215_s2 + $0x174] ss:$8 sps:$4 sm:$0xff]  }
  0x7d   : > { %v1673_v13 = vld [vmem:[%s2215_s2 + $0x170] ss:$8 sps:$4 sm:$0xff]  }
  0x7f   : > { %690 = vmatpush1.bf16.msra.mxu1 %v1598_v2 }
  0x80   : > { %691 = vmatprep.subr.bf16.mxu1 %v1603_v3 }
  0x83   : > { %692 = vmatpush1.bf16.msra.mxu1 %v1601_v4 }
  0x86   : > { %694 = vmatmul.mubr.bf16.vlgmr.msra.gmra.mrb[8].mxu1 %v1863_v35  ;;  %v1649_v35 = vld [vmem:[%s2215_s2 + $0xf4] ss:$8 sps:$4 sm:$0xff]  }
  0x87   : > { %703 = vmatprep.mubr.bf16.mxu1 %v1871_v38  ;;  %1206 = vmatprep.subr.bf16.mxu0 %v1649_v35 }
  0x88   : > { %1207 = vmatpush1.bf16.msra.mxu0 %v1651_v36 }
  0x89   : > { %1227 = vmatprep.subr.bf16.mxu0 %v1654_v37 }
  0x8e   : > { %704 = vmatmul.mubr.bf16.gmra.mrb[12].mxu1 %v1353_v41 }
 0x119   : > { %v2063_v38 = vpop.f32.mrb[0].mxu1 }
 0x11a   : > { %v2065_v39 = vpop.f32.mrb[1].mxu1  ;;  %v712_v47 = vmul.f32 %v2063_v38, %v2063_v38 }
 0x11b   : > { %v2067_v40 = vpop.f32.mrb[2].mxu1  ;;  %v713_v50 = vmul.f32 %v2065_v39, %v2065_v39 }
 0x11c   : > { %v2069_v41 = vpop.f32.mrb[3].mxu1  ;;  %v714_v54 = vmul.f32 %v2067_v40, %v2067_v40 }
 0x11d   : > { %v715_v58 = vmul.f32 %v2069_v41, %v2069_v41 }
 0x121   : > { %v2071_v42 = vpop.f32.mrb[4].mxu1 }
 0x122   : > { %v2073_v43 = vpop.f32.mrb[5].mxu1  ;;  %v716_v5 = vmul.f32 %v2071_v42, %v2071_v42 }
 0x123   : > { %v658_v44 = vpop.f32.mrb[6].mxu1  ;;  %v717_v8 = vmul.f32 %v2073_v43, %v2073_v43 }
 0x124   : > { %v659_v45 = vpop.f32.mrb[7].mxu1 }
 0x159   : > { %v695_v46 = vpop.f32.mrb[8].mxu1 }
 0x15a   : > { %v718_v48 = vmul.f32 %v695_v46, %v695_v46  ;;  %v697_v49 = vpop.f32.mrb[9].mxu1 }
 0x15b   : > { %v719_v52 = vmul.f32 %v697_v49, %v697_v49  ;;  %v699_v53 = vpop.f32.mrb[10].mxu1 }
 0x15c   : > { %v724_v55 = vadd.f32 %v718_v48, %v712_v47  ;;  %v720_v56 = vmul.f32 %v699_v53, %v699_v53  ;;  %v701_v57 = vpop.f32.mrb[11].mxu1 }
 0x15d   : > { %v725_v59 = vadd.f32 %v719_v52, %v713_v50  ;;  %v721_v60 = vmul.f32 %v701_v57, %v701_v57 }
 0x15e   : > { %v730_v61 = vadd.f32 1e-30, %v724_v55  ;;  %v726_v62 = vadd.f32 %v720_v56, %v714_v54 }
 0x15f   : > { %v731_v0 = vadd.f32 1e-30, %v725_v59  ;;  %v727_v1 = vadd.f32 %v721_v60, %v715_v58 }
 0x160   : > { %1700 = vrsqrt.f32 %v730_v61  ;;  %v732_v2 = vadd.f32 1e-30, %v726_v62 }
 0x161   : > { %1702 = vrsqrt.f32 %v731_v0  ;;  %v733_v3 = vadd.f32 1e-30, %v727_v1  ;;  %v705_v4 = vpop.f32.mrb[12].mxu1  ;;  %v1655_v0 = vld [vmem:[%s2215_s2 + $0x110] ss:$8 sps:$4 sm:$0xff]  }
 0x162   : > { %1704 = vrsqrt.f32 %v732_v2  ;;  %v722_v6 = vmul.f32 %v705_v4, %v705_v4  ;;  %v707_v7 = vpop.f32.mrb[13].mxu1  ;;  %v1660_v2 = vld [vmem:[%s2215_s2 + $0x124] ss:$8 sps:$4 sm:$0xff]  }
 0x163   : > { %1706 = vrsqrt.f32 %v733_v3  ;;  %v723_v10 = vmul.f32 %v707_v7, %v707_v7  ;;  %v709_v11 = vpop.f32.mrb[14].mxu1 }
 0x164   : > { %v728_v14 = vadd.f32 %v722_v6, %v716_v5  ;;  %v710_v15 = vpop.f32.mrb[15].mxu1  ;;  %v1663_v5 = vld [vmem:[%s2215_s2 + $0x134] ss:$8 sps:$4 sm:$0xff]   ;;  %v1666_v6 = vld [vmem:[%s2215_s2 + $0x144] ss:$8 sps:$4 sm:$0xff]  }
 0x165   : > { %v729_v16 = vadd.f32 %v723_v10, %v717_v8  ;;  %v1669_v8 = vld [vmem:[%s2215_s2 + $0x154] ss:$8 sps:$4 sm:$0xff]   ;;  %v1672_v10 = vld [vmem:[%s2215_s2 + $0x164] ss:$8 sps:$4 sm:$0xff]   ;;  %v1670_v11 = vld [vmem:[%s2215_s2 + $0x160] ss:$8 sps:$4 sm:$0xff]  }
 0x166   : > { %v734_v17 = vadd.f32 1e-30, %v728_v14  ;;  %v1678_v14 = vld [vmem:[%s2215_s2 + $0x184] ss:$8 sps:$4 sm:$0xff]   ;;  %v1676_v15 = vld [vmem:[%s2215_s2 + $0x180] ss:$8 sps:$4 sm:$0xff]  }
 0x167   : > { %v735_v19 = vadd.f32 1e-30, %v729_v16  ;;  %v1681_v16 = vld [vmem:[%s2215_s2 + $0x194] ss:$8 sps:$4 sm:$0xff]  }
 0x168   : > { %1708 = vrsqrt.f32 %v734_v17  ;;  %v1679_v17 = vld [vmem:[%s2215_s2 + $0x190] ss:$8 sps:$4 sm:$0xff]  }
 0x169   : > { %1710 = vrsqrt.f32 %v735_v19  ;;  %v1682_v19 = vld [vmem:[%s2215_s2 + $0x1a0] ss:$8 sps:$4 sm:$0xff]  }
 0x16a   : > { %v1701_v21 = vpop.eup %1700 }
 0x16b   : > { %v1703_v22 = vpop.eup %1702  ;;  %v754_v23 = vmul.f32 %v1701_v21, %v747_v18  ;;  %v1685_v21 = vld [vmem:[%s2215_s2 + $0x1b0] ss:$8 sps:$4 sm:$0xff]  }
 0x16c   : > { %v1705_v24 = vpop.eup %1704  ;;  %v755_v25 = vmul.f32 %v1703_v22, %v751_v20  ;;  %v1690_v22 = vld [vmem:[%s2215_s2 + $0x1c4] ss:$8 sps:$4 sm:$0xff]  }
 0x16d   : > { %v1707_v26 = vpop.eup %1706  ;;  %v760_v27 = vsub.f32 1.0, %v754_v23  ;;  %v756_v28 = vmul.f32 %v1705_v24, %v747_v18  ;;  %v1688_v23 = vld [vmem:[%s2215_s2 + $0x1c0] ss:$8 sps:$4 sm:$0xff]   ;;  %v1693_v24 = vld [vmem:[%s2215_s2 + $0x1d4] ss:$8 sps:$4 sm:$0xff]  }
 0x16e   : > { %v761_v29 = vsub.f32 1.0, %v755_v25  ;;  %v757_v30 = vmul.f32 %v1707_v26, %v751_v20  ;;  %v1691_v25 = vld [vmem:[%s2215_s2 + $0x1d0] ss:$8 sps:$4 sm:$0xff]   ;;  %v1696_v26 = vld [vmem:[%s2215_s2 + $0x1e4] ss:$8 sps:$4 sm:$0xff]  }
 0x16f   : > { %v766_v31 = vmax.f32 %v760_v27, 0.0  ;;  %v762_v32 = vsub.f32 1.0, %v756_v28  ;;  %v1694_v27 = vld [vmem:[%s2215_s2 + $0x1e0] ss:$8 sps:$4 sm:$0xff]   ;;  %v1699_v28 = vld [vmem:[%s2215_s2 + $0x1f4] ss:$8 sps:$4 sm:$0xff]  }
 0x170   : > { %v767_v33 = vmax.f32 %v761_v29, 0.0  ;;  %v763_v34 = vsub.f32 1.0, %v757_v30  ;;  %v1697_v29 = vld [vmem:[%s2215_s2 + $0x1f0] ss:$8 sps:$4 sm:$0xff]  }
 0x171   : > { %v772_v35 = vmul.f32 %v766_v31, %v2063_v38  ;;  %v2091_v36 = vmul.f32 %v766_v31, %v695_v46  ;;  %v768_v37 = vmax.f32 %v762_v32, 0.0 }
 0x172   : > { %v1709_v44 = vpop.eup %1708  ;;  %v779_v45 = vmul.f32 %v767_v33, %v697_v49  ;;  %v769_v47 = vmax.f32 %v763_v34, 0.0  ;;  %v773_v48 = vmul.f32 %v767_v33, %v2065_v39  ;;  %v1652_v39 = vld [vmem:[%s2215_s2 + $0x100] ss:$8 sps:$4 sm:$0xff]  }
 0x173   : > { %v1711_v50 = vpop.eup %1710  ;;  %v774_v51 = vmul.f32 %v768_v37, %v2067_v40  ;;  %v2095_v52 = vmul.f32 %v768_v37, %v699_v53  ;;  %v758_v54 = vmul.f32 %v1709_v44, %v747_v18  ;;  %v1657_v53 = vld [vmem:[%s2215_s2 + $0x114] ss:$8 sps:$4 sm:$0xff]   ;;  %v1684_v18 = vld [vmem:[%s2215_s2 + $0x1a4] ss:$8 sps:$4 sm:$0xff]  }
 0x174   : > { %v781_v55 = vmul.f32 %v769_v47, %v701_v57  ;;  %v759_v56 = vmul.f32 %v1711_v50, %v751_v20  ;;  %v775_v58 = vmul.f32 %v769_v47, %v2069_v41  ;;  %v1687_v20 = vld [vmem:[%s2215_s2 + $0x1b4] ss:$8 sps:$4 sm:$0xff]  }
 0x175   : > { %v786_v38 = vpack.c.bf16 %v2095_v52, %v2091_v36  ;;  %v764_v46 = vsub.f32 1.0, %v758_v54  ;;  %v784_v59 = vpack.c.bf16 %v774_v51, %v772_v35 }
 0x176   : > { %v787_v60 = vpack.c.bf16 %v781_v55, %v779_v45  ;;  %v765_v49 = vsub.f32 1.0, %v759_v56  ;;  %v785_v61 = vpack.c.bf16 %v775_v58, %v773_v48 }
 0x177   : > { %v770_v40 = vmax.f32 %v764_v46, 0.0 }
 0x178   : > { %v771_v57 = vmax.f32 %v765_v49, 0.0  ;;  %1208 = vmatprep.mubr.bf16.mxu0 %v785_v61 }
 0x179   : > { %v2106_v41 = vmul.f32 %v770_v40, %v705_v4  ;;  %1209 = vmatmul.mubr.bf16.vlgmr.msra.gmra.mrb[0].mxu0 %v784_v59  ;;  %v776_v62 = vmul.f32 %v770_v40, %v2071_v42  ;;  %v1658_v42 = vld [vmem:[%s2215_s2 + $0x120] ss:$8 sps:$4 sm:$0xff]  }
 0x17a   : > { %v2109_v63 = vmul.f32 %v771_v57, %v707_v7  ;;  %1228 = vmatpush1.bf16.msra.mxu0 %v1652_v39  ;;  %v777_v1 = vmul.f32 %v771_v57, %v2073_v43  ;;  %v1661_v43 = vld [vmem:[%s2215_s2 + $0x130] ss:$8 sps:$4 sm:$0xff]   ;;  %v1664_v7 = vld [vmem:[%s2215_s2 + $0x140] ss:$8 sps:$4 sm:$0xff]  }
 0x17b   : > { %1229 = vmatprep.subr.bf16.mxu0 %v1657_v53  ;;  %v788_v4 = vpack.c.bf16 %v776_v62, %v776_v62  ;;  %v790_v31 = vpack.c.bf16 %v2106_v41, %v2106_v41 }
 0x17c   : > { %v789_v3 = vpack.c.bf16 %v777_v1, %v777_v1  ;;  %v791_v30 = vpack.c.bf16 %v2109_v63, %v2109_v63 }
 0x17e   : > { %1230 = vmatpush1.bf16.msra.mxu0 %v1655_v0  ;;  %1218 = vmatprep.mubr.bf16.mxu0 %v789_v3 }
 0x17f   : > { %1231 = vmatprep.subr.bf16.mxu0 %v1660_v2 }
 0x181   : > { %1219 = vmatmul.mubr.bf16.gmra.mrb[4].mxu0 %v788_v4 }
 0x182   : > { %1232 = vmatpush1.bf16.msra.mxu0 %v1658_v42  ;;  %1259 = vmatprep.mubr.bf16.mxu0 %v787_v60 }
 0x183   : > { %1233 = vmatprep.subr.bf16.mxu0 %v1663_v5 }
 0x186   : > { %1234 = vmatpush1.bf16.msra.mxu0 %v1661_v43 }
 0x187   : > { %1235 = vmatprep.subr.bf16.mxu0 %v1666_v6 }
 0x18a   : > { %1236 = vmatpush1.bf16.msra.mxu0 %v1664_v7 }
 0x18b   : > { %1237 = vmatprep.subr.bf16.mxu0 %v1669_v8 }
 0x18e   : > { %1238 = vmatpush1.bf16.msra.mxu0 %v1667_v9 }
 0x18f   : > { %1239 = vmatprep.subr.bf16.mxu0 %v1672_v10 }
 0x192   : > { %1240 = vmatpush1.bf16.msra.mxu0 %v1670_v11 }
 0x193   : > { %1241 = vmatprep.subr.bf16.mxu0 %v1675_v12 }
 0x196   : > { %1242 = vmatpush1.bf16.msra.mxu0 %v1673_v13 }
 0x197   : > { %1243 = vmatprep.subr.bf16.mxu0 %v1678_v14 }
 0x19a   : > { %1244 = vmatpush1.bf16.msra.mxu0 %v1676_v15 }
 0x19b   : > { %1245 = vmatprep.subr.bf16.mxu0 %v1681_v16 }
 0x19e   : > { %1246 = vmatpush1.bf16.msra.mxu0 %v1679_v17 }
 0x19f   : > { %1247 = vmatprep.subr.bf16.mxu0 %v1684_v18 }
 0x1a2   : > { %1248 = vmatpush1.bf16.msra.mxu0 %v1682_v19 }
 0x1a3   : > { %1249 = vmatprep.subr.bf16.mxu0 %v1687_v20 }
 0x1a6   : > { %1250 = vmatpush1.bf16.msra.mxu0 %v1685_v21 }
 0x1a7   : > { %1251 = vmatprep.subr.bf16.mxu0 %v1690_v22 }
 0x1aa   : > { %1252 = vmatpush1.bf16.msra.mxu0 %v1688_v23 }
 0x1ab   : > { %1253 = vmatprep.subr.bf16.mxu0 %v1693_v24 }
 0x1ae   : > { %1254 = vmatpush1.bf16.msra.mxu0 %v1691_v25 }
 0x1af   : > { %1255 = vmatprep.subr.bf16.mxu0 %v1696_v26 }
 0x1b2   : > { %1256 = vmatpush1.bf16.msra.mxu0 %v1694_v27 }
 0x1b3   : > { %1257 = vmatprep.subr.bf16.mxu0 %v1699_v28 }
 0x1b6   : > { %1258 = vmatpush1.bf16.msra.mxu0 %v1697_v29 }
 0x1b9   : > { %1260 = vmatmul.mubr.bf16.vlgmr.msra.gmra.mrb[0].mxu0 %v786_v38 }
 0x1ba   : > { %1269 = vmatprep.mubr.bf16.mxu0 %v791_v30 }
 0x1c1   : > { %1270 = vmatmul.mubr.bf16.gmra.mrb[4].mxu0 %v790_v31 }
 0x28c   : > { %v1261_v32 = vpop.f32.mrb[0].mxu0 }
 0x28d   : > { %1278 = vst [vmem:[%s204_s19] sm:$0xff] %v1261_v32  ;;  %v1263_v33 = vpop.f32.mrb[1].mxu0 }
 0x28e   : > { %1279 = vst [vmem:[%s204_s19 + $0x8] sm:$0xff] %v1263_v33  ;;  %v1265_v34 = vpop.f32.mrb[2].mxu0 }
 0x28f   : > { %1280 = vst [vmem:[%s204_s19 + $0x10] sm:$0xff] %v1265_v34  ;;  %v1267_v35 = vpop.f32.mrb[3].mxu0 }
 0x290   : > { %1281 = vst [vmem:[%s204_s19 + $0x18] sm:$0xff] %v1267_v35 }
 0x294   : > { %v1271_v36 = vpop.f32.mrb[4].mxu0 }
 0x295   : > { %1282 = vst [vmem:[%s204_s19 + $0x20] sm:$0xff] %v1271_v36  ;;  %v1273_v37 = vpop.f32.mrb[5].mxu0 }
 0x296   : > { %1283 = vst [vmem:[%s204_s19 + $0x28] sm:$0xff] %v1273_v37  ;;  %v1275_v44 = vpop.f32.mrb[6].mxu0 }
 0x297   : > { %v1276_v45 = vpop.f32.mrb[7].mxu0 }
 0x298 PF: > { %s14_s15 = sadd.s32 1, %s1718_s15  }
 0x299   : > { %p11_p4 = scmp.ge.s32.totalorder %s14_s15, 4  }
 0x29b   :  { %13 = sbr.rel (!%p11_p4) target bundleno = 1 (0x1), region = 66 }

</bundles_post_ra>
